<compile_context>
chip_gen: v6e
topology: v6e:2x2x1
jax: 0.10.0
libtpu: 0.0.40
codegen_flags: <defaults>
</compile_context>

<pallas_src>
import jax
import jax.numpy as jnp
from jax.experimental import pallas as pl
from jax.experimental.pallas import tpu as pltpu


def _gcn_spatial_g_kernel(x_ref, w_ref, o_ref):
    # x_ref : (B, H, C_in + 1)   last channel is the constant 1.0 bias column
    # w_ref : (C_in + 1, 2*C_out) fused [w1^T | w2^T] with [b1 | b2] row appended
    # o_ref : (B, H, H)
    B, H, Cp = x_ref.shape
    c_out = w_ref.shape[1] // 2

    # One tall matmul for both pointwise (1x1 conv) projections, bias folded in.
    x = x_ref[...].reshape(B * H, Cp)                       # (B*H, C_in+1)
    p = jnp.dot(x, w_ref[...], preferred_element_type=jnp.float32)  # (B*H, 2*C_out)
    p1 = p[:, :c_out].reshape(B, H, c_out)
    p2 = p[:, c_out:].reshape(B, H, c_out)

    # Batched Gram: g[b] = p1[b] @ p2[b]^T — contract last axes of both operands
    # directly (no explicit transpose materialization).
    g = jnp.einsum('bhc,bkc->bhk', p1, p2,
                   preferred_element_type=jnp.float32)      # (B, H, H)

    # Row-wise, max-stabilized softmax; approx reciprocal routes to the EUP.
    g = g - jnp.max(g, axis=-1, keepdims=True)
    e = jnp.exp(g)
    inv = pl.reciprocal(jnp.sum(e, axis=-1, keepdims=True), approx=True)
    o_ref[...] = (e * inv).astype(o_ref.dtype)


def gcn_spatial_g(x, w1, b1, w2, b2, *, block_b=128):
    """x: (N, C_in, H, W) float32. w*: (C_out, C_in), b*: (C_out,).
    Returns (N, W, H, H) float32 == softmax(P1 @ P2^T, axis=-1)."""
    N, C_in, H, W = x.shape
    C_out = w1.shape[0]
    NW = N * W

    # NCHW -> (N, W, H, C_in) -> (N*W, H, C_in); append ones column so the conv
    # biases fold into the fused projection weight (no bias add in the kernel).
    x_b = jnp.transpose(x, (0, 3, 2, 1)).reshape(NW, H, C_in)
    x_b = jnp.concatenate([x_b, jnp.ones((NW, H, 1), x_b.dtype)], axis=-1)

    # Fused weight: (C_in+1, 2*C_out) = [[w1^T | w2^T], [b1 | b2]]
    w_f = jnp.concatenate(
        [jnp.concatenate([w1.T, w2.T], axis=1),
         jnp.concatenate([b1, b2]).reshape(1, 2 * C_out)],
        axis=0).astype(jnp.float32)

    # Per-step batch of (n, w) slices: large enough to amortize the ~0.35us
    # per grid-step overhead, but keep >=2 grid steps so a "parallel" grid axis
    # can be sharded across both v7x TensorCores.
    B = min(block_b, NW)
    if B == NW and NW >= 2:
        B = pl.cdiv(NW, 2)
    num_blocks = pl.cdiv(NW, B)
    NW_pad = num_blocks * B
    if NW_pad != NW:
        x_b = jnp.pad(x_b, ((0, NW_pad - NW), (0, 0), (0, 0)))

    # VMEM footprint (double-buffered) is ~2*B*(H*(C_in+1) + H*H)*4 bytes —
    # a few hundred KiB at B=128, far under the default scoped VMEM limit on
    # v5e/v6e/v7x, so no vmem_limit_bytes override is needed.
    out = pl.pallas_call(
        _gcn_spatial_g_kernel,
        out_shape=jax.ShapeDtypeStruct((NW_pad, H, H), jnp.float32),
        grid_spec=pltpu.PrefetchScalarGridSpec(
            num_scalar_prefetch=0,
            grid=(num_blocks,),
            in_specs=[
                pl.BlockSpec((B, H, C_in + 1), lambda i: (i, 0, 0)),
                pl.BlockSpec((C_in + 1, 2 * C_out), lambda i: (0, 0)),
            ],
            out_specs=pl.BlockSpec((B, H, H), lambda i: (i, 0, 0)),
        ),
        compiler_params=pltpu.CompilerParams(
            dimension_semantics=("parallel",)),
    )(x_b, w_f)

    return out[:NW].reshape(N, W, H, H)


def _reference(x, w1, b1, w2, b2):
    # pure-JAX reference mirroring the PyTorch module
    c1 = jnp.einsum('nchw,oc->nohw', x, w1) + b1[None, :, None, None]
    c2 = jnp.einsum('nchw,oc->nohw', x, w2) + b2[None, :, None, None]
    gcn_g = jnp.transpose(c1, (0, 3, 2, 1))   # (N, W, H, C_out)
    g2 = jnp.transpose(c2, (0, 3, 1, 2))      # (N, W, C_out, H)
    g3 = jnp.einsum('nwhc,nwck->nwhk', gcn_g, g2)
    return jax.nn.softmax(g3, axis=-1)


if __name__ == "__main__":
    key = jax.random.PRNGKey(0)
    N, C_in, H, W = 2, 4, 16, 16      # batch, in_channels, joints, segments
    C_out = 8

    k_x, k_w1, k_b1, k_w2, k_b2 = jax.random.split(key, 5)
    x = jax.random.normal(k_x, (N, C_in, H, W), dtype=jnp.float32)
    scale = 1.0 / (C_in ** 0.5)
    w1 = jax.random.normal(k_w1, (C_out, C_in), dtype=jnp.float32) * scale
    b1 = jax.random.normal(k_b1, (C_out,), dtype=jnp.float32) * 0.1
    w2 = jax.random.normal(k_w2, (C_out, C_in), dtype=jnp.float32) * scale
    b2 = jax.random.normal(k_b2, (C_out,), dtype=jnp.float32) * 0.1

    out = jax.block_until_ready(gcn_spatial_g(x, w1, b1, w2, b2))
    ref = _reference(x, w1, b1, w2, b2)

    assert out.shape == (N, W, H, H)
    # approx reciprocal in the softmax normalizer -> slightly looser tolerance
    assert jnp.allclose(out, ref, atol=2e-3, rtol=2e-3), "mismatch vs reference"

    print("KERNEL_OK")
</pallas_src>

<mosaic_0001>
module attributes {stable_mosaic.version = 11 : i64} {
  func.func @_gcn_spatial_g_kernel(%arg0: i32, %arg1: memref<16x16x5xf32, #tpu.memory_space<vmem>>, %arg2: memref<5x16xf32, #tpu.memory_space<vmem>>, %arg3: memref<16x16x16xf32, #tpu.memory_space<vmem>>) attributes {dimension_semantics = [#tpu.dimension_semantics<parallel>], iteration_bounds = array<i64: 2>, scalar_prefetch = 0 : i64, scratch_operands = 0 : i64, tpu.core_type = #tpu.core_type<tc>, window_params = [{transform_indices = @transform_0, window_bounds = array<i64: 16, 16, 5>}, {pipeline_mode = #tpu.pipeline_mode<synchronous>, transform_indices = @transform_1, window_bounds = array<i64: 5, 16>}, {transform_indices = @transform_2, window_bounds = array<i64: 16, 16, 16>}]} {
    %c0 = arith.constant 0 : index
    %c0_0 = arith.constant 0 : index
    %c0_1 = arith.constant 0 : index
    %0 = vector.load %arg1[%c0, %c0_0, %c0_1] : memref<16x16x5xf32, #tpu.memory_space<vmem>>, vector<16x16x5xf32>
    %1 = vector.shape_cast %0 : vector<16x16x5xf32> to vector<256x5xf32>
    %c0_2 = arith.constant 0 : index
    %c0_3 = arith.constant 0 : index
    %2 = vector.load %arg2[%c0_2, %c0_3] : memref<5x16xf32, #tpu.memory_space<vmem>>, vector<5x16xf32>
    %cst = arith.constant dense<0.000000e+00> : vector<256x16xf32>
    %3 = tpu.matmul %1, %2, %cst {dimension_numbers = #tpu.dot_dimension_numbers<[1], [0], [0], [1], [0, 0, 1, 1], [], []>} : vector<256x5xf32>, vector<5x16xf32>, vector<256x16xf32> -> vector<256x16xf32>
    %4 = vector.extract_strided_slice %3 {offsets = [0, 0], sizes = [256, 8], strides = [1, 1]} : vector<256x16xf32> to vector<256x8xf32>
    %5 = vector.shape_cast %4 : vector<256x8xf32> to vector<16x16x8xf32>
    %6 = vector.extract_strided_slice %3 {offsets = [0, 8], sizes = [256, 8], strides = [1, 1]} : vector<256x16xf32> to vector<256x8xf32>
    %7 = vector.shape_cast %6 : vector<256x8xf32> to vector<16x16x8xf32>
    "tpu.trace_start"() <{level = 10 : i32, message = "bhc,bkc->bhk"}> : () -> ()
    %cst_4 = arith.constant dense<0.000000e+00> : vector<16x16x16xf32>
    %8 = tpu.matmul %5, %7, %cst_4 {dimension_numbers = #tpu.dot_dimension_numbers<[2], [2], [1], [1], [0, 0, 0, 1, 1, 1], [0], [0]>} : vector<16x16x8xf32>, vector<16x16x8xf32>, vector<16x16x16xf32> -> vector<16x16x16xf32>
    "tpu.trace_stop"() : () -> ()
    %cst_5 = arith.constant dense<0xFF800000> : vector<16x16xf32>
    %9 = vector.multi_reduction <maximumf>, %8, %cst_5 [2] : vector<16x16x16xf32> to vector<16x16xf32>
    %10 = vector.shape_cast %9 : vector<16x16xf32> to vector<16x16x1xf32>
    %11 = vector.broadcast %10 : vector<16x16x1xf32> to vector<16x16x16xf32>
    %12 = arith.subf %8, %11 : vector<16x16x16xf32>
    %13 = math.exp %12 : vector<16x16x16xf32>
    %cst_6 = arith.constant dense<0.000000e+00> : vector<16x16xf32>
    %14 = vector.multi_reduction <add>, %13, %cst_6 [2] : vector<16x16x16xf32> to vector<16x16xf32>
    %15 = vector.shape_cast %14 : vector<16x16xf32> to vector<16x16x1xf32>
    %16 = tpu.reciprocal %15 {approx = true} : vector<16x16x1xf32> -> vector<16x16x1xf32>
    %17 = vector.broadcast %16 : vector<16x16x1xf32> to vector<16x16x16xf32>
    %18 = arith.mulf %13, %17 : vector<16x16x16xf32>
    %c0_7 = arith.constant 0 : index
    %c0_8 = arith.constant 0 : index
    %c0_9 = arith.constant 0 : index
    %19 = vector.load %arg3[%c0_7, %c0_8, %c0_9] : memref<16x16x16xf32, #tpu.memory_space<vmem>>, vector<16x16x16xf32>
    tpu.vector_store %arg3[%c0_7, %c0_8, %c0_9], %18 {strides = array<i32>} : memref<16x16x16xf32, #tpu.memory_space<vmem>>, vector<16x16x16xf32>,
    return
  }
  func.func @transform_0(%arg0: i32) -> (i32, i32, i32) {
    %c0_i32 = arith.constant 0 : i32
    %c0_i32_0 = arith.constant 0 : i32
    %c0_i32_1 = arith.constant 0 : i32
    return %arg0, %c0_i32, %c0_i32_0 : i32, i32, i32
  }
  func.func @transform_1(%arg0: i32) -> (i32, i32) {
    %c0_i32 = arith.constant 0 : i32
    %c0_i32_0 = arith.constant 0 : i32
    %c0_i32_1 = arith.constant 0 : i32
    return %c0_i32, %c0_i32_0 : i32, i32
  }
  func.func @transform_2(%arg0: i32) -> (i32, i32, i32) {
    %c0_i32 = arith.constant 0 : i32
    %c0_i32_0 = arith.constant 0 : i32
    %c0_i32_1 = arith.constant 0 : i32
    return %arg0, %c0_i32, %c0_i32_0 : i32, i32, i32
  }
}

</mosaic_0001>

<bundles_post_ra>
// kernel: tpu_custom_call.1
= control target key start
LH: loop header
LB: loop body
LE: loop exit
PB: predicated region body
PF: predicated region fallthrough
CT: control target
= control target key end

     0   :  { %s2911_s9 = smov 0   ;;  %s3638_s0 = inlined_call_operand.vmem [shape: f32[32,16,5], index: 0, kind: input, shape index: {}]   ;;  %s3639_s1 = inlined_call_operand.vmem [shape: f32[5,16], index: 1, kind: input, shape index: {}]   ;;  %s3640_s2 = inlined_call_operand.vmem [shape: f32[32,16,16], index: 2, kind: output, shape index: {}]  }
   0x1 LB: > { %s2379_s10 = sadd.s32 4294967295, %s2893_s9   ;;  %p2383_p0 = scmp.ge.s32.totalorder %s2893_s9, 1  ;;  %s2893_s9 = sphi %s2911_s9, %s12_s9  }
   0x2   : > { %p114_p1 = scmp.lt.s32.totalorder %s2893_s9, 3 }
   0x4   : > { %p115_p2 = pnand %p2383_p0, %p114_p1 }
   0x5   : > { %s2384_s13 = sshll.u32 (!%p115_p2), %s2379_s10, 4  ;;  %s2895_s18 = smov (!%p115_p2), 120  }
   0x6   : > { %118 = sbr.rel (%p115_p2) target bundleno = 928 (0x3a0), region = 28  ;;  %p139_p3 = scmp.lt.s32.totalorder (!%p115_p2), %s2384_s13, 31 }
   0xb   : > { %v184_v0 = vld [vmem:[%s3639_s1] sm:$0x1f]  ;;  %vm282_vm0 = vcmask 1044480   ;;  %s3642_s13 = smov (!%p139_p3, %s2384_s13), 31  ;;  %vm185_vm1 = vcmask 39936   ;;  %vm517_vm2 = vcmask 64512  }
   0xc   : > { %2588 = vmatprep.subr.msk.mxu0 %vm282_vm0, %v184_v0  ;;  %s2489_s14 = sshll.u32 %s3642_s13, 4  ;;  %vm1936_vm3 = vcmask 130048  }
   0xd   : > { %2589 = vmatpush3.msk.msra.mxu0 %vm282_vm0, %v184_v0  ;;  %s2930_s17 = scalar_lea.vmem %s3638_s0, %s2489_s14  ;;  %s3537_s21 = scalar_lea.vmem %s3640_s2, %s2489_s14 }
   0xe   : > { %v152_v1 = vld [vmem:[%s2930_s17] sm:$0xff]  ;;  %v153_v2 = vld [vmem:[%s2930_s17 + $0x8] sm:$0xff]  ;;  %v154_v3 = vld [vmem:[%s2930_s17 + $0x10] sm:$0xff] }
   0xf   : > { %2590 = vmatprep.mubr.msk.f32.mxu0 %vm185_vm1, %v152_v1  ;;  %v155_v4 = vld [vmem:[%s2930_s17 + $0x18] sm:$0xff]  ;;  %v156_v5 = vld [vmem:[%s2930_s17 + $0x20] sm:$0xff]  ;;  %v157_v6 = vld [vmem:[%s2930_s17 + $0x28] sm:$0xff] }
  0x10   : > { %2591 = vmatmul.mubr.msk.f32.vlgmr.msra.gmra.mxu0 %vm185_vm1, %v153_v2  ;;  %v158_v7 = vld [vmem:[%s2930_s17 + $0x30] sm:$0xff]  ;;  %v159_v8 = vld [vmem:[%s2930_s17 + $0x38] sm:$0xff]  ;;  %v160_v9 = vld [vmem:[%s2930_s17 + $0x40] sm:$0xff] }
  0x11   : > { %2593 = vmatprep.mubr.msk.f32.mxu0 %vm185_vm1, %v154_v3  ;;  %v161_v10 = vld [vmem:[%s2930_s17 + $0x48] sm:$0xff]  ;;  %v162_v11 = vld [vmem:[%s2930_s17 + $0x50] sm:$0xff]  ;;  %v163_v12 = vld [vmem:[%s2930_s17 + $0x58] sm:$0xff] }
  0x12   : > { %v164_v13 = vld [vmem:[%s2930_s17 + $0x60] sm:$0xff]  ;;  %v165_v14 = vld [vmem:[%s2930_s17 + $0x68] sm:$0xff]  ;;  %v166_v15 = vld [vmem:[%s2930_s17 + $0x70] sm:$0xff] }
  0x13   : > { %v167_v16 = vld [vmem:[%s2930_s17 + $0x78] sm:$0xff]  ;;  %v168_v17 = vld [vmem:[%s2930_s17 + $0x80] sm:$0xff]  ;;  %v169_v18 = vld [vmem:[%s2930_s17 + $0x88] sm:$0xff] }
  0x14   : > { %2594 = vmatmul.mubr.msk.f32.gmra.mxu0 %vm185_vm1, %v155_v4  ;;  %v170_v19 = vld [vmem:[%s2930_s17 + $0x90] sm:$0xff]  ;;  %v171_v20 = vld [vmem:[%s2930_s17 + $0x98] sm:$0xff]  ;;  %v172_v21 = vld [vmem:[%s2930_s17 + $0xa0] sm:$0xff] }
  0x15   : > { %2596 = vmatprep.mubr.msk.f32.mxu0 %vm185_vm1, %v156_v5  ;;  %v173_v22 = vld [vmem:[%s2930_s17 + $0xa8] sm:$0xff]  ;;  %v174_v23 = vld [vmem:[%s2930_s17 + $0xb0] sm:$0xff]  ;;  %v175_v24 = vld [vmem:[%s2930_s17 + $0xb8] sm:$0xff] }
  0x16   : > { %v176_v25 = vld [vmem:[%s2930_s17 + $0xc0] sm:$0xff]  ;;  %v177_v26 = vld [vmem:[%s2930_s17 + $0xc8] sm:$0xff]  ;;  %v178_v27 = vld [vmem:[%s2930_s17 + $0xd0] sm:$0xff] }
  0x17   : > { %v179_v28 = vld [vmem:[%s2930_s17 + $0xd8] sm:$0xff]  ;;  %v180_v29 = vld [vmem:[%s2930_s17 + $0xe0] sm:$0xff]  ;;  %v181_v30 = vld [vmem:[%s2930_s17 + $0xe8] sm:$0xff] }
  0x18   : > { %2597 = vmatmul.mubr.msk.f32.gmra.mxu0 %vm185_vm1, %v157_v6  ;;  %v182_v31 = vld [vmem:[%s2930_s17 + $0xf0] sm:$0xff]  ;;  %v183_v32 = vld [vmem:[%s2930_s17 + $0xf8] sm:$0xff] }
  0x19   : > { %2599 = vmatprep.mubr.msk.f32.mxu0 %vm185_vm1, %v158_v7 }
  0x1c   : > { %2600 = vmatmul.mubr.msk.f32.gmra.mxu0 %vm185_vm1, %v159_v8 }
  0x1d   : > { %2602 = vmatprep.mubr.msk.f32.mxu0 %vm185_vm1, %v160_v9 }
  0x20   : > { %2603 = vmatmul.mubr.msk.f32.gmra.mxu0 %vm185_vm1, %v161_v10 }
  0x21   : > { %2605 = vmatprep.mubr.msk.f32.mxu0 %vm185_vm1, %v162_v11 }
  0x24   : > { %2606 = vmatmul.mubr.msk.f32.gmra.mxu0 %vm185_vm1, %v163_v12 }
  0x25   : > { %2608 = vmatprep.mubr.msk.f32.mxu0 %vm185_vm1, %v164_v13 }
  0x28   : > { %2609 = vmatmul.mubr.msk.f32.gmra.mxu0 %vm185_vm1, %v165_v14 }
  0x29   : > { %2611 = vmatprep.mubr.msk.f32.mxu0 %vm185_vm1, %v166_v15 }
  0x2c   : > { %2612 = vmatmul.mubr.msk.f32.gmra.mxu0 %vm185_vm1, %v167_v16 }
  0x2d   : > { %2614 = vmatprep.mubr.msk.f32.mxu0 %vm185_vm1, %v168_v17 }
  0x30   : > { %2615 = vmatmul.mubr.msk.f32.gmra.mxu0 %vm185_vm1, %v169_v18 }
  0x31   : > { %2617 = vmatprep.mubr.msk.f32.mxu0 %vm185_vm1, %v170_v19 }
  0x34   : > { %2618 = vmatmul.mubr.msk.f32.gmra.mxu0 %vm185_vm1, %v171_v20 }
  0x35   : > { %2620 = vmatprep.mubr.msk.f32.mxu0 %vm185_vm1, %v172_v21 }
  0x38   : > { %2621 = vmatmul.mubr.msk.f32.gmra.mxu0 %vm185_vm1, %v173_v22 }
  0x39   : > { %2623 = vmatprep.mubr.msk.f32.mxu0 %vm185_vm1, %v174_v23 }
  0x3c   : > { %2624 = vmatmul.mubr.msk.f32.gmra.mxu0 %vm185_vm1, %v175_v24 }
  0x3d   : > { %2626 = vmatprep.mubr.msk.f32.mxu0 %vm185_vm1, %v176_v25 }
  0x40   : > { %2627 = vmatmul.mubr.msk.f32.gmra.mxu0 %vm185_vm1, %v177_v26 }
  0x41   : > { %2629 = vmatprep.mubr.msk.f32.mxu0 %vm185_vm1, %v178_v27 }
  0x44   : > { %2630 = vmatmul.mubr.msk.f32.gmra.mxu0 %vm185_vm1, %v179_v28 }
  0x45   : > { %2632 = vmatprep.mubr.msk.f32.mxu0 %vm185_vm1, %v180_v29 }
  0x48   : > { %2633 = vmatmul.mubr.msk.f32.gmra.mxu0 %vm185_vm1, %v181_v30 }
  0x49   : > { %2635 = vmatprep.mubr.msk.f32.mxu0 %vm185_vm1, %v182_v31 }
  0x4c   : > { %2636 = vmatmul.mubr.msk.f32.gmra.mxu0 %vm185_vm1, %v183_v32 }
  0xd0   : > { %v2996_v33 = vpop.f32.mrf.mxu0 }
  0xd1   : > { %515 = vrot.lane.b32.xlu0 %v2996_v33, %s2895_s18 }
  0xd2   : > { %v352_v34 = vpop.f32.mrf.mxu0 }
  0xd3   : > { %2642 = vmatprep.mubr.msk.f32.mxu1 %vm517_vm2, %v352_v34 }
  0xd4   : > { %v3001_v35 = vpop.f32.mrf.mxu0 }
  0xd5   : > { %513 = vrot.lane.b32.xlu0 %v352_v34, %s2895_s18  ;;  %605 = vrot.lane.b32.xlu1 %v3001_v35, %s2895_s18 }
  0xd6   : > { %v3006_v36 = vpop.f32.mrf.mxu0 }
  0xd8   : > { %v3008_v37 = vpop.f32.mrf.mxu0 }
  0xd9   : > { %603 = vrot.lane.b32.xlu1 %v3006_v36, %s2895_s18  ;;  %694 = vrot.lane.b32.xlu0 %v3008_v37, %s2895_s18 }
  0xda   : > { %v3014_v38 = vpop.f32.mrf.mxu0 }
  0xdc   : > { %v3016_v39 = vpop.f32.mrf.mxu0 }
  0xdd   : > { %692 = vrot.lane.b32.xlu1 %v3014_v38, %s2895_s18  ;;  %783 = vrot.lane.b32.xlu0 %v3016_v39, %s2895_s18 }
  0xde   : > { %v3022_v40 = vpop.f32.mrf.mxu0 }
  0xe0   : > { %v3024_v41 = vpop.f32.mrf.mxu0 }
  0xe1   : > { %781 = vrot.lane.b32.xlu1 %v3022_v40, %s2895_s18  ;;  %872 = vrot.lane.b32.xlu0 %v3024_v41, %s2895_s18 }
  0xe2   : > { %v3030_v42 = vpop.f32.mrf.mxu0 }
  0xe4   : > { %v3032_v43 = vpop.f32.mrf.mxu0 }
  0xe5   : > { %870 = vrot.lane.b32.xlu1 %v3030_v42, %s2895_s18  ;;  %961 = vrot.lane.b32.xlu0 %v3032_v43, %s2895_s18 }
  0xe6   : > { %v3038_v44 = vpop.f32.mrf.mxu0 }
  0xe8   : > { %v3040_v45 = vpop.f32.mrf.mxu0 }
  0xe9   : > { %959 = vrot.lane.b32.xlu1 %v3038_v44, %s2895_s18  ;;  %1050 = vrot.lane.b32.xlu0 %v3040_v45, %s2895_s18 }
  0xea   : > { %v3046_v46 = vpop.f32.mrf.mxu0 }
  0xec   : > { %v3048_v47 = vpop.f32.mrf.mxu0 }
  0xed   : > { %1048 = vrot.lane.b32.xlu1 %v3046_v46, %s2895_s18  ;;  %1139 = vrot.lane.b32.xlu0 %v3048_v47, %s2895_s18 }
  0xee   : > { %v3054_v48 = vpop.f32.mrf.mxu0 }
  0xf0   : > { %v3056_v49 = vpop.f32.mrf.mxu0 }
  0xf1   : > { %1137 = vrot.lane.b32.xlu1 %v3054_v48, %s2895_s18  ;;  %1228 = vrot.lane.b32.xlu0 %v3056_v49, %s2895_s18 }
  0xf2   : > { %v432_v50 = vpop.f32.mrf.mxu0 }
  0xf3   : > { %2698 = vmatprep.mubr.msk.f32.mxu0 %vm517_vm2, %v432_v50 }
  0xf4   : > { %v3063_v51 = vpop.f32.mrf.mxu0 }
  0xf5   : > { %1226 = vrot.lane.b32.xlu0 %v432_v50, %s2895_s18  ;;  %1317 = vrot.lane.b32.xlu1 %v3063_v51, %s2895_s18 }
  0xf6   : > { %v3068_v52 = vpop.f32.mrf.mxu0 }
  0xf8   : > { %v3070_v53 = vpop.f32.mrf.mxu0 }
  0xf9   : > { %1406 = vrot.lane.b32.xlu0 %v3070_v53, %s2895_s18  ;;  %1315 = vrot.lane.b32.xlu1 %v3068_v52, %s2895_s18 }
  0xfa   : > { %v3076_v54 = vpop.f32.mrf.mxu0 }
  0xfc   : > { %v3078_v55 = vpop.f32.mrf.mxu0 }
  0xfd   : > { %1404 = vrot.lane.b32.xlu0 %v3076_v54, %s2895_s18  ;;  %1495 = vrot.lane.b32.xlu1 %v3078_v55, %s2895_s18 }
  0xfe   : > { %v3084_v56 = vpop.f32.mrf.mxu0 }
 0x100   : > { %v3086_v57 = vpop.f32.mrf.mxu0 }
 0x101   : > { %1584 = vrot.lane.b32.xlu0 %v3086_v57, %s2895_s18  ;;  %1493 = vrot.lane.b32.xlu1 %v3084_v56, %s2895_s18 }
 0x102   : > { %v3092_v58 = vpop.f32.mrf.mxu0 }
 0x104   : > { %v3094_v59 = vpop.f32.mrf.mxu0 }
 0x105   : > { %1582 = vrot.lane.b32.xlu0 %v3092_v58, %s2895_s18  ;;  %1673 = vrot.lane.b32.xlu1 %v3094_v59, %s2895_s18 }
 0x106   : > { %v3100_v60 = vpop.f32.mrf.mxu0 }
 0x108   : > { %v3102_v61 = vpop.f32.mrf.mxu0 }
 0x109   : > { %1762 = vrot.lane.b32.xlu0 %v3102_v61, %s2895_s18  ;;  %1671 = vrot.lane.b32.xlu1 %v3100_v60, %s2895_s18 }
 0x10a   : > { %v3108_v62 = vpop.f32.mrf.mxu0 }
 0x10c   : > { %v3110_v63 = vpop.f32.mrf.mxu0 }
 0x10d   : > { %1760 = vrot.lane.b32.xlu0 %v3108_v62, %s2895_s18  ;;  %1851 = vrot.lane.b32.xlu1 %v3110_v63, %s2895_s18 }
 0x10e   : > { %v3116_v0 = vpop.f32.mrf.mxu0 }
 0x111   : > { %1849 = vrot.lane.b32.xlu1 %v3116_v0, %s2895_s18 }
 0x143   : > { %v516_v1 = vpop.permute.xlu0 %515 }
 0x144   : > { %2638 = vmatprep.subr.msk.mxu1 %vm517_vm2, %v516_v1 }
 0x145   : > { %2639 = vmatpush3.xpose.msk.msra.mxu1 %vm517_vm2, %v516_v1 }
 0x147   : > { %v514_v2 = vpop.permute.xlu0 %513  ;;  %v606_v3 = vpop.permute.xlu1 %605 }
 0x148   : > { %2640 = vmatprep.subr.msk.mxu1 %vm517_vm2, %v514_v2 }
 0x149   : > { %2641 = vmatpush3.xpose.msk.msra.mxu1 %vm517_vm2, %v514_v2 }
 0x14a   : > { %2645 = vmatprep.subr.msk.mxu1 %vm517_vm2, %v606_v3 }
 0x14b   : > { %v695_v4 = vpop.permute.xlu0 %694  ;;  %v604_v5 = vpop.permute.xlu1 %603 }
 0x14c   : > { %2643 = vmatmul.mubr.msk.f32.vlgmr.msra.gmra.mxu1 %vm517_vm2, %v2996_v33 }
 0x14d   : > { %2646 = vmatpush3.xpose.msk.msra.mxu1 %vm517_vm2, %v606_v3  ;;  %2649 = vmatprep.mubr.msk.f32.mxu1 %vm517_vm2, %v3006_v36 }
 0x14e   : > { %2647 = vmatprep.subr.msk.mxu1 %vm517_vm2, %v604_v5 }
 0x14f   : > { %v784_v6 = vpop.permute.xlu0 %783  ;;  %v693_v8 = vpop.permute.xlu1 %692 }
 0x151   : > { %2648 = vmatpush3.xpose.msk.msra.mxu1 %vm517_vm2, %v604_v5 }
 0x152   : > { %2652 = vmatprep.subr.msk.mxu1 %vm517_vm2, %v695_v4 }
 0x153   : > { %v873_v7 = vpop.permute.xlu0 %872  ;;  %v782_v10 = vpop.permute.xlu1 %781 }
 0x154   : > { %2650 = vmatmul.mubr.msk.f32.vlgmr.msra.gmra.mxu1 %vm517_vm2, %v3001_v35 }
 0x155   : > { %2653 = vmatpush3.xpose.msk.msra.mxu1 %vm517_vm2, %v695_v4  ;;  %2656 = vmatprep.mubr.msk.f32.mxu1 %vm517_vm2, %v3014_v38 }
 0x156   : > { %2654 = vmatprep.subr.msk.mxu1 %vm517_vm2, %v693_v8 }
 0x157   : > { %v962_v9 = vpop.permute.xlu0 %961  ;;  %v871_v12 = vpop.permute.xlu1 %870 }
 0x159   : > { %2655 = vmatpush3.xpose.msk.msra.mxu1 %vm517_vm2, %v693_v8 }
 0x15a   : > { %2659 = vmatprep.subr.msk.mxu1 %vm517_vm2, %v784_v6 }
 0x15b   : > { %v1051_v11 = vpop.permute.xlu0 %1050  ;;  %v960_v14 = vpop.permute.xlu1 %959 }
 0x15c   : > { %2657 = vmatmul.mubr.msk.f32.vlgmr.msra.gmra.mxu1 %vm517_vm2, %v3008_v37 }
 0x15d   : > { %2660 = vmatpush3.xpose.msk.msra.mxu1 %vm517_vm2, %v784_v6  ;;  %2663 = vmatprep.mubr.msk.f32.mxu1 %vm517_vm2, %v3022_v40 }
 0x15e   : > { %2661 = vmatprep.subr.msk.mxu1 %vm517_vm2, %v782_v10 }
 0x15f   : > { %v1140_v13 = vpop.permute.xlu0 %1139  ;;  %v1049_v17 = vpop.permute.xlu1 %1048 }
 0x161   : > { %2662 = vmatpush3.xpose.msk.msra.mxu1 %vm517_vm2, %v782_v10 }
 0x162   : > { %2666 = vmatprep.subr.msk.mxu1 %vm517_vm2, %v873_v7 }
 0x163   : > { %v1229_v15 = vpop.permute.xlu0 %1228  ;;  %v1138_v19 = vpop.permute.xlu1 %1137 }
 0x164   : > { %2664 = vmatmul.mubr.msk.f32.vlgmr.msra.gmra.mxu1 %vm517_vm2, %v3016_v39  ;;  %2694 = vmatprep.subr.msk.mxu0 %vm517_vm2, %v1229_v15 }
 0x165   : > { %2667 = vmatpush3.xpose.msk.msra.mxu1 %vm517_vm2, %v873_v7  ;;  %2670 = vmatprep.mubr.msk.f32.mxu1 %vm517_vm2, %v3030_v42 }
 0x166   : > { %2695 = vmatpush3.xpose.msk.msra.mxu0 %vm517_vm2, %v1229_v15  ;;  %2668 = vmatprep.subr.msk.mxu1 %vm517_vm2, %v871_v12 }
 0x167   : > { %v1227_v16 = vpop.permute.xlu0 %1226  ;;  %v1318_v22 = vpop.permute.xlu1 %1317 }
 0x168   : > { %2696 = vmatprep.subr.msk.mxu0 %vm517_vm2, %v1227_v16 }
 0x169   : > { %2669 = vmatpush3.xpose.msk.msra.mxu1 %vm517_vm2, %v871_v12 }
 0x16a   : > { %2697 = vmatpush3.xpose.msk.msra.mxu0 %vm517_vm2, %v1227_v16  ;;  %2673 = vmatprep.subr.msk.mxu1 %vm517_vm2, %v962_v9 }
 0x16b   : > { %v1407_v18 = vpop.permute.xlu0 %1406  ;;  %v1316_v25 = vpop.permute.xlu1 %1315 }
 0x16c   : > { %2671 = vmatmul.mubr.msk.f32.vlgmr.msra.gmra.mxu1 %vm517_vm2, %v3024_v41  ;;  %2708 = vmatprep.subr.msk.mxu0 %vm517_vm2, %v1407_v18 }
 0x16d   : > { %2699 = vmatmul.mubr.msk.f32.vlgmr.msra.gmra.mxu0 %vm517_vm2, %v3056_v49  ;;  %2674 = vmatpush3.xpose.msk.msra.mxu1 %vm517_vm2, %v962_v9 }
 0x16e   : > { %2677 = vmatprep.mubr.msk.f32.mxu1 %vm517_vm2, %v3038_v44  ;;  %2709 = vmatpush3.xpose.msk.msra.mxu0 %vm517_vm2, %v1407_v18 }
 0x16f   : > { %2712 = vmatprep.mubr.msk.f32.mxu0 %vm517_vm2, %v3076_v54  ;;  %2675 = vmatprep.subr.msk.mxu1 %vm517_vm2, %v960_v14  ;;  %v1405_v20 = vpop.permute.xlu0 %1404  ;;  %v1496_v27 = vpop.permute.xlu1 %1495 }
 0x170   : > { %2710 = vmatprep.subr.msk.mxu0 %vm517_vm2, %v1405_v20 }
 0x171   : > { %2676 = vmatpush3.xpose.msk.msra.mxu1 %vm517_vm2, %v960_v14 }
 0x172   : > { %2711 = vmatpush3.xpose.msk.msra.mxu0 %vm517_vm2, %v1405_v20  ;;  %2680 = vmatprep.subr.msk.mxu1 %vm517_vm2, %v1051_v11 }
 0x173   : > { %v1585_v21 = vpop.permute.xlu0 %1584  ;;  %v1494_v28 = vpop.permute.xlu1 %1493 }
 0x174   : > { %2678 = vmatmul.mubr.msk.f32.vlgmr.msra.gmra.mxu1 %vm517_vm2, %v3032_v43  ;;  %2722 = vmatprep.subr.msk.mxu0 %vm517_vm2, %v1585_v21 }
 0x175   : > { %2713 = vmatmul.mubr.msk.f32.vlgmr.msra.gmra.mxu0 %vm517_vm2, %v3070_v53  ;;  %2681 = vmatpush3.xpose.msk.msra.mxu1 %vm517_vm2, %v1051_v11 }
 0x176   : > { %2684 = vmatprep.mubr.msk.f32.mxu1 %vm517_vm2, %v3046_v46  ;;  %2723 = vmatpush3.xpose.msk.msra.mxu0 %vm517_vm2, %v1585_v21 }
 0x177   : > { %2726 = vmatprep.mubr.msk.f32.mxu0 %vm517_vm2, %v3092_v58  ;;  %2682 = vmatprep.subr.msk.mxu1 %vm517_vm2, %v1049_v17  ;;  %v1583_v23 = vpop.permute.xlu0 %1582  ;;  %v1674_v29 = vpop.permute.xlu1 %1673 }
 0x178   : > { %2724 = vmatprep.subr.msk.mxu0 %vm517_vm2, %v1583_v23 }
 0x179   : > { %2683 = vmatpush3.xpose.msk.msra.mxu1 %vm517_vm2, %v1049_v17 }
 0x17a   : > { %2725 = vmatpush3.xpose.msk.msra.mxu0 %vm517_vm2, %v1583_v23  ;;  %2687 = vmatprep.subr.msk.mxu1 %vm517_vm2, %v1140_v13 }
 0x17b   : > { %v1763_v24 = vpop.permute.xlu0 %1762  ;;  %v1672_v30 = vpop.permute.xlu1 %1671 }
 0x17c   : > { %2685 = vmatmul.mubr.msk.f32.vlgmr.msra.gmra.mxu1 %vm517_vm2, %v3040_v45  ;;  %2736 = vmatprep.subr.msk.mxu0 %vm517_vm2, %v1763_v24 }
 0x17d   : > { %2727 = vmatmul.mubr.msk.f32.vlgmr.msra.gmra.mxu0 %vm517_vm2, %v3086_v57  ;;  %2688 = vmatpush3.xpose.msk.msra.mxu1 %vm517_vm2, %v1140_v13 }
 0x17e   : > { %2691 = vmatprep.mubr.msk.f32.mxu1 %vm517_vm2, %v3054_v48  ;;  %2737 = vmatpush3.xpose.msk.msra.mxu0 %vm517_vm2, %v1763_v24 }
 0x17f   : > { %2740 = vmatprep.mubr.msk.f32.mxu0 %vm517_vm2, %v3108_v62  ;;  %2689 = vmatprep.subr.msk.mxu1 %vm517_vm2, %v1138_v19  ;;  %v1761_v26 = vpop.permute.xlu0 %1760  ;;  %v1852_v31 = vpop.permute.xlu1 %1851 }
 0x180   : > { %2738 = vmatprep.subr.msk.mxu0 %vm517_vm2, %v1761_v26 }
 0x181   : > { %2690 = vmatpush3.xpose.msk.msra.mxu1 %vm517_vm2, %v1138_v19 }
 0x182   : > { %2739 = vmatpush3.xpose.msk.msra.mxu0 %vm517_vm2, %v1761_v26  ;;  %2701 = vmatprep.subr.msk.mxu1 %vm517_vm2, %v1318_v22 }
 0x183   : > { %v1850_v32 = vpop.permute.xlu1 %1849 }
 0x184   : > { %2692 = vmatmul.mubr.msk.f32.vlgmr.msra.gmra.mxu1 %vm517_vm2, %v3048_v47 }
 0x185   : > { %2741 = vmatmul.mubr.msk.f32.vlgmr.msra.gmra.mxu0 %vm517_vm2, %v3102_v61  ;;  %2702 = vmatpush3.xpose.msk.msra.mxu1 %vm517_vm2, %v1318_v22 }
 0x186   : > { %2705 = vmatprep.mubr.msk.f32.mxu1 %vm517_vm2, %v3068_v52  ;;  %2703 = vmatprep.subr.msk.mxu1 %vm517_vm2, %v1316_v25 }
 0x189   : > { %2704 = vmatpush3.xpose.msk.msra.mxu1 %vm517_vm2, %v1316_v25 }
 0x18a   : > { %2715 = vmatprep.subr.msk.mxu1 %vm517_vm2, %v1496_v27 }
 0x18c   : > { %2706 = vmatmul.mubr.msk.f32.vlgmr.msra.gmra.mxu1 %vm517_vm2, %v3063_v51 }
 0x18d   : > { %2716 = vmatpush3.xpose.msk.msra.mxu1 %vm517_vm2, %v1496_v27  ;;  %2719 = vmatprep.mubr.msk.f32.mxu1 %vm517_vm2, %v3084_v56 }
 0x18e   : > { %2717 = vmatprep.subr.msk.mxu1 %vm517_vm2, %v1494_v28 }
 0x191   : > { %2718 = vmatpush3.xpose.msk.msra.mxu1 %vm517_vm2, %v1494_v28 }
 0x192   : > { %2729 = vmatprep.subr.msk.mxu1 %vm517_vm2, %v1674_v29 }
 0x194   : > { %2720 = vmatmul.mubr.msk.f32.vlgmr.msra.gmra.mxu1 %vm517_vm2, %v3078_v55 }
 0x195   : > { %2730 = vmatpush3.xpose.msk.msra.mxu1 %vm517_vm2, %v1674_v29  ;;  %2733 = vmatprep.mubr.msk.f32.mxu1 %vm517_vm2, %v3100_v60 }
 0x196   : > { %2731 = vmatprep.subr.msk.mxu1 %vm517_vm2, %v1672_v30 }
 0x199   : > { %2732 = vmatpush3.xpose.msk.msra.mxu1 %vm517_vm2, %v1672_v30 }
 0x19a   : > { %2743 = vmatprep.subr.msk.mxu1 %vm517_vm2, %v1852_v31 }
 0x19c   : > { %2734 = vmatmul.mubr.msk.f32.vlgmr.msra.gmra.mxu1 %vm517_vm2, %v3094_v59 }
 0x19d   : > { %2744 = vmatpush3.xpose.msk.msra.mxu1 %vm517_vm2, %v1852_v31  ;;  %2747 = vmatprep.mubr.msk.f32.mxu1 %vm517_vm2, %v3116_v0 }
 0x19e   : > { %2745 = vmatprep.subr.msk.mxu1 %vm517_vm2, %v1850_v32 }
 0x1a1   : > { %2746 = vmatpush3.xpose.msk.msra.mxu1 %vm517_vm2, %v1850_v32 }
 0x1a4   : > { %2748 = vmatmul.mubr.msk.f32.vlgmr.msra.gmra.mxu1 %vm517_vm2, %v3110_v63 }
 0x20c   : > { %v3244_v33 = vpop.f32.mrf.mxu1 }
 0x20d   : > { %v1940_v34 = vsel %vm1936_vm3, %v3244_v33, -inf }
 0x20e   : > { %v3248_v35 = vpop.f32.mrf.mxu1  ;;  %1941 = vmax.xlane.f32.xlu1 %v1940_v34 }
 0x20f   : > { %v1937_v36 = vsel %vm1936_vm3, %v3248_v35, -inf }
 0x210   : > { %1938 = vmax.xlane.f32.xlu0 %v1937_v36 }
 0x214   : > { %v3252_v37 = vpop.f32.mrf.mxu1 }
 0x215   : > { %v1946_v38 = vsel %vm1936_vm3, %v3252_v37, -inf }
 0x216   : > { %v3256_v39 = vpop.f32.mrf.mxu1  ;;  %1947 = vmax.xlane.f32.xlu0 %v1946_v38 }
 0x217   : > { %v1943_v40 = vsel %vm1936_vm3, %v3256_v39, -inf }
 0x21a   : > { %1944 = vmax.xlane.f32.xlu0 %v1943_v40 }
 0x21c   : > { %v3260_v41 = vpop.f32.mrf.mxu1 }
 0x21d   : > { %v1952_v42 = vsel %vm1936_vm3, %v3260_v41, -inf }
 0x21e   : > { %v3264_v43 = vpop.f32.mrf.mxu1  ;;  %1953 = vmax.xlane.f32.xlu0 %v1952_v42 }
 0x21f   : > { %v1949_v44 = vsel %vm1936_vm3, %v3264_v43, -inf }
 0x220   : > { %1950 = vmax.xlane.f32.xlu1 %v1949_v44 }
 0x224   : > { %v3268_v45 = vpop.f32.mrf.mxu1 }
 0x225   : > { %v1958_v46 = vsel %vm1936_vm3, %v3268_v45, -inf }
 0x226   : > { %v3272_v47 = vpop.f32.mrf.mxu1  ;;  %1959 = vmax.xlane.f32.xlu0 %v1958_v46 }
 0x227   : > { %v1955_v48 = vsel %vm1936_vm3, %v3272_v47, -inf }
 0x228   : > { %1956 = vmax.xlane.f32.xlu1 %v1955_v48 }
 0x22c   : > { %v3276_v49 = vpop.f32.mrf.mxu1 }
 0x22d   : > { %v3278_v50 = vpop.f32.mrf.mxu0  ;;  %v1964_v51 = vsel %vm1936_vm3, %v3276_v49, -inf }
 0x22e   : > { %v3282_v52 = vpop.f32.mrf.mxu1  ;;  %1965 = vmax.xlane.f32.xlu0 %v1964_v51  ;;  %v1988_v55 = vsel %vm1936_vm3, %v3278_v50, -inf }
 0x22f   : > { %v1961_v53 = vsel %vm1936_vm3, %v3282_v52, -inf  ;;  %v3286_v54 = vpop.f32.mrf.mxu0 }
 0x230   : > { %1962 = vmax.xlane.f32.xlu1 %v1961_v53  ;;  %v1985_v56 = vsel %vm1936_vm3, %v3286_v54, -inf }
 0x232   : > { %1989 = vmax.xlane.f32.xlu0 %v1988_v55 }
 0x234   : > { %v3292_v57 = vpop.f32.mrf.mxu1  ;;  %1986 = vmax.xlane.f32.xlu1 %v1985_v56 }
 0x235   : > { %v3294_v58 = vpop.f32.mrf.mxu0  ;;  %v1970_v59 = vsel %vm1936_vm3, %v3292_v57, -inf }
 0x236   : > { %v3298_v60 = vpop.f32.mrf.mxu1  ;;  %1971 = vmax.xlane.f32.xlu0 %v1970_v59  ;;  %v2000_v63 = vsel %vm1936_vm3, %v3294_v58, -inf }
 0x237   : > { %v1967_v61 = vsel %vm1936_vm3, %v3298_v60, -inf  ;;  %v3302_v62 = vpop.f32.mrf.mxu0 }
 0x238   : > { %1968 = vmax.xlane.f32.xlu1 %v1967_v61  ;;  %v1997_v0 = vsel %vm1936_vm3, %v3302_v62, -inf }
 0x23a   : > { %2001 = vmax.xlane.f32.xlu0 %v2000_v63 }
 0x23c   : > { %v3308_v1 = vpop.f32.mrf.mxu1  ;;  %1998 = vmax.xlane.f32.xlu1 %v1997_v0 }
 0x23d   : > { %v3310_v2 = vpop.f32.mrf.mxu0  ;;  %v1976_v3 = vsel %vm1936_vm3, %v3308_v1, -inf }
 0x23e   : > { %v3314_v4 = vpop.f32.mrf.mxu1  ;;  %1977 = vmax.xlane.f32.xlu0 %v1976_v3  ;;  %v2012_v7 = vsel %vm1936_vm3, %v3310_v2, -inf }
 0x23f   : > { %v1973_v5 = vsel %vm1936_vm3, %v3314_v4, -inf  ;;  %v3318_v6 = vpop.f32.mrf.mxu0 }
 0x240   : > { %1974 = vmax.xlane.f32.xlu1 %v1973_v5  ;;  %v2009_v8 = vsel %vm1936_vm3, %v3318_v6, -inf }
 0x242   : > { %2013 = vmax.xlane.f32.xlu0 %v2012_v7 }
 0x244   : > { %v3324_v9 = vpop.f32.mrf.mxu1  ;;  %2010 = vmax.xlane.f32.xlu1 %v2009_v8 }
 0x245   : > { %v3326_v10 = vpop.f32.mrf.mxu0  ;;  %v1982_v11 = vsel %vm1936_vm3, %v3324_v9, -inf }
 0x246   : > { %v3330_v12 = vpop.f32.mrf.mxu1  ;;  %1983 = vmax.xlane.f32.xlu0 %v1982_v11  ;;  %v2024_v15 = vsel %vm1936_vm3, %v3326_v10, -inf }
 0x247   : > { %v1979_v13 = vsel %vm1936_vm3, %v3330_v12, -inf  ;;  %v3334_v14 = vpop.f32.mrf.mxu0 }
 0x248   : > { %1980 = vmax.xlane.f32.xlu1 %v1979_v13  ;;  %v2021_v16 = vsel %vm1936_vm3, %v3334_v14, -inf }
 0x24a   : > { %2025 = vmax.xlane.f32.xlu0 %v2024_v15 }
 0x24c   : > { %v3340_v17 = vpop.f32.mrf.mxu1  ;;  %2022 = vmax.xlane.f32.xlu1 %v2021_v16 }
 0x24d   : > { %v1994_v18 = vsel %vm1936_vm3, %v3340_v17, -inf }
 0x24e   : > { %v3344_v19 = vpop.f32.mrf.mxu1  ;;  %1995 = vmax.xlane.f32.xlu0 %v1994_v18 }
 0x24f   : > { %v1991_v20 = vsel %vm1936_vm3, %v3344_v19, -inf }
 0x250   : > { %1992 = vmax.xlane.f32.xlu1 %v1991_v20 }
 0x254   : > { %v3348_v21 = vpop.f32.mrf.mxu1 }
 0x255   : > { %v2006_v22 = vsel %vm1936_vm3, %v3348_v21, -inf }
 0x256   : > { %v3352_v23 = vpop.f32.mrf.mxu1  ;;  %2007 = vmax.xlane.f32.xlu0 %v2006_v22 }
 0x257   : > { %v2003_v24 = vsel %vm1936_vm3, %v3352_v23, -inf }
 0x258   : > { %2004 = vmax.xlane.f32.xlu1 %v2003_v24 }
 0x25c   : > { %v3356_v25 = vpop.f32.mrf.mxu1 }
 0x25d   : > { %v2018_v26 = vsel %vm1936_vm3, %v3356_v25, -inf }
 0x25e   : > { %v3360_v27 = vpop.f32.mrf.mxu1  ;;  %2019 = vmax.xlane.f32.xlu0 %v2018_v26 }
 0x25f   : > { %v2015_v28 = vsel %vm1936_vm3, %v3360_v27, -inf }
 0x260   : > { %2016 = vmax.xlane.f32.xlu1 %v2015_v28 }
 0x264   : > { %v3364_v29 = vpop.f32.mrf.mxu1 }
 0x265   : > { %v2030_v30 = vsel %vm1936_vm3, %v3364_v29, -inf }
 0x266   : > { %v3368_v31 = vpop.f32.mrf.mxu1  ;;  %2031 = vmax.xlane.f32.xlu0 %v2030_v30 }
 0x267   : > { %v2027_v32 = vsel %vm1936_vm3, %v3368_v31, -inf }
 0x268   : > { %2028 = vmax.xlane.f32.xlu1 %v2027_v32 }
 0x297   : > { %v1942_v34 = vpop.xlane.xlu1 %1941 }
 0x298   : > { %v2034_v36 = vsub.f32 %v3244_v33, %v1942_v34 }
 0x299   : > { %v1939_v38 = vpop.xlane.xlu0 %1938 }
 0x29a   : > { %v2067_v40 = vmul.f32 1.442695, %v2034_v36  ;;  %v2033_v42 = vsub.f32 %v3248_v35, %v1939_v38 }
 0x29c   : > { %2759 = vpow2.f32 %v2067_v40  ;;  %v2065_v44 = vmul.f32 1.442695, %v2033_v42 }
 0x29e   : > { %2761 = vpow2.f32 %v2065_v44 }
 0x29f   : > { %v1948_v46 = vpop.xlane.xlu0 %1947 }
 0x2a0   : > { %v2036_v48 = vsub.f32 %v3252_v37, %v1948_v46 }
 0x2a2   : > { %v2071_v51 = vmul.f32 1.442695, %v2036_v48 }
 0x2a3   : > { %v1945_v53 = vpop.xlane.xlu0 %1944 }
 0x2a4   : > { %2763 = vpow2.f32 %v2071_v51  ;;  %v2035_v55 = vsub.f32 %v3256_v39, %v1945_v53 }
 0x2a6   : > { %v2069_v56 = vmul.f32 1.442695, %v2035_v55 }
 0x2a7   : > { %v1954_v59 = vpop.xlane.xlu0 %1953 }
 0x2a8   : > { %2765 = vpow2.f32 %v2069_v56  ;;  %v2038_v33 = vsub.f32 %v3260_v41, %v1954_v59 }
 0x2a9   : > { %v3377_v61 = vpop.eup %2759  ;;  %v1951_v63 = vpop.xlane.xlu1 %1950 }
 0x2aa   : > { %v2075_v35 = vmul.f32 1.442695, %v2038_v33  ;;  %v2037_v0 = vsub.f32 %v3264_v43, %v1951_v63  ;;  %v2132_v3 = vsel %vm1936_vm3, %v3377_v61, 0.0 }
 0x2ab   : > { %v3382_v37 = vpop.eup %2761  ;;  %2133 = vadd.xlane.f32.xlu0 %v2132_v3 }
 0x2ac   : > { %2767 = vpow2.f32 %v2075_v35  ;;  %v2073_v5 = vmul.f32 1.442695, %v2037_v0  ;;  %v2129_v39 = vsel %vm1936_vm3, %v3382_v37, 0.0 }
 0x2ad   : > { %2130 = vadd.xlane.f32.xlu1 %v2129_v39 }
 0x2ae   : > { %2769 = vpow2.f32 %v2073_v5 }
 0x2af   : > { %v1960_v41 = vpop.xlane.xlu0 %1959 }
 0x2b0   : > { %v2040_v7 = vsub.f32 %v3268_v45, %v1960_v41 }
 0x2b1   : > { %v3387_v8 = vpop.eup %2763  ;;  %v1957_v11 = vpop.xlane.xlu1 %1956 }
 0x2b2   : > { %v2079_v43 = vmul.f32 1.442695, %v2040_v7  ;;  %v2039_v13 = vsub.f32 %v3272_v47, %v1957_v11  ;;  %v2138_v15 = vsel %vm1936_vm3, %v3387_v8, 0.0 }
 0x2b3   : > { %2139 = vadd.xlane.f32.xlu0 %v2138_v15 }
 0x2b4   : > { %2771 = vpow2.f32 %v2079_v43  ;;  %v2077_v16 = vmul.f32 1.442695, %v2039_v13 }
 0x2b5   : > { %v3392_v18 = vpop.eup %2765 }
 0x2b6   : > { %2773 = vpow2.f32 %v2077_v16  ;;  %v2135_v20 = vsel %vm1936_vm3, %v3392_v18, 0.0 }
 0x2b7   : > { %v1966_v22 = vpop.xlane.xlu0 %1965  ;;  %2136 = vadd.xlane.f32.xlu1 %v2135_v20 }
 0x2b8   : > { %v2042_v45 = vsub.f32 %v3276_v49, %v1966_v22 }
 0x2b9   : > { %v3397_v24 = vpop.eup %2767  ;;  %v1963_v26 = vpop.xlane.xlu1 %1962 }
 0x2ba   : > { %v2083_v47 = vmul.f32 1.442695, %v2042_v45  ;;  %v2041_v28 = vsub.f32 %v3282_v52, %v1963_v26  ;;  %v2144_v30 = vsel %vm1936_vm3, %v3397_v24, 0.0 }
 0x2bb   : > { %v3402_v32 = vpop.eup %2769  ;;  %v1990_v34 = vpop.xlane.xlu0 %1989  ;;  %2145 = vadd.xlane.f32.xlu0 %v2144_v30 }
 0x2bc   : > { %2775 = vpow2.f32 %v2083_v47  ;;  %v2081_v36 = vmul.f32 1.442695, %v2041_v28  ;;  %v2050_v38 = vsub.f32 %v3278_v50, %v1990_v34  ;;  %v2141_v49 = vsel %vm1936_vm3, %v3402_v32, 0.0 }
 0x2bd   : > { %v1987_v40 = vpop.xlane.xlu1 %1986  ;;  %2142 = vadd.xlane.f32.xlu1 %v2141_v49 }
 0x2be   : > { %2777 = vpow2.f32 %v2081_v36  ;;  %v2099_v42 = vmul.f32 1.442695, %v2050_v38  ;;  %v2049_v52 = vsub.f32 %v3286_v54, %v1987_v40 }
 0x2bf   : > { %v1972_v44 = vpop.xlane.xlu0 %1971 }
 0x2c0   : > { %2779 = vpow2.f32 %v2099_v42  ;;  %v2097_v46 = vmul.f32 1.442695, %v2049_v52  ;;  %v2044_v48 = vsub.f32 %v3292_v57, %v1972_v44 }
 0x2c1   : > { %v3409_v51 = vpop.eup %2771  ;;  %v1969_v53 = vpop.xlane.xlu1 %1968 }
 0x2c2   : > { %2781 = vpow2.f32 %v2097_v46  ;;  %v2087_v55 = vmul.f32 1.442695, %v2044_v48  ;;  %v2043_v50 = vsub.f32 %v3298_v60, %v1969_v53  ;;  %v2150_v56 = vsel %vm1936_vm3, %v3409_v51, 0.0 }
 0x2c3   : > { %v3414_v59 = vpop.eup %2773  ;;  %v2002_v33 = vpop.xlane.xlu0 %2001  ;;  %2151 = vadd.xlane.f32.xlu0 %v2150_v56 }
 0x2c4   : > { %2783 = vpow2.f32 %v2087_v55  ;;  %v2085_v54 = vmul.f32 1.442695, %v2043_v50  ;;  %v2054_v63 = vsub.f32 %v3294_v58, %v2002_v33  ;;  %v2147_v57 = vsel %vm1936_vm3, %v3414_v59, 0.0 }
 0x2c5   : > { %v1999_v35 = vpop.xlane.xlu1 %1998  ;;  %2148 = vadd.xlane.f32.xlu1 %v2147_v57 }
 0x2c6   : > { %2785 = vpow2.f32 %v2085_v54  ;;  %v2107_v0 = vmul.f32 1.442695, %v2054_v63  ;;  %v2053_v60 = vsub.f32 %v3302_v62, %v1999_v35 }
 0x2c7   : > { %v1978_v3 = vpop.xlane.xlu0 %1977 }
 0x2c8   : > { %2787 = vpow2.f32 %v2107_v0  ;;  %v2105_v5 = vmul.f32 1.442695, %v2053_v60  ;;  %v2046_v39 = vsub.f32 %v3308_v1, %v1978_v3 }
 0x2c9   : > { %v3421_v41 = vpop.eup %2775  ;;  %v1975_v7 = vpop.xlane.xlu1 %1974 }
 0x2ca   : > { %2789 = vpow2.f32 %v2105_v5  ;;  %v2091_v11 = vmul.f32 1.442695, %v2046_v39  ;;  %v2045_v58 = vsub.f32 %v3314_v4, %v1975_v7  ;;  %v2156_v43 = vsel %vm1936_vm3, %v3421_v41, 0.0 }
 0x2cb   : > { %v3426_v13 = vpop.eup %2777  ;;  %v2014_v15 = vpop.xlane.xlu0 %2013  ;;  %2157 = vadd.xlane.f32.xlu0 %v2156_v43 }
 0x2cc   : > { %2791 = vpow2.f32 %v2091_v11  ;;  %v2089_v62 = vmul.f32 1.442695, %v2045_v58  ;;  %v2058_v16 = vsub.f32 %v3310_v2, %v2014_v15  ;;  %v2153_v1 = vsel %vm1936_vm3, %v3426_v13, 0.0 }
 0x2cd   : > { %v3431_v20 = vpop.eup %2779  ;;  %v2011_v22 = vpop.xlane.xlu1 %2010  ;;  %2154 = vadd.xlane.f32.xlu1 %v2153_v1 }
 0x2ce   : > { %2793 = vpow2.f32 %v2089_v62  ;;  %v2115_v4 = vmul.f32 1.442695, %v2058_v16  ;;  %v2057_v45 = vsub.f32 %v3318_v6, %v2011_v22  ;;  %v2180_v26 = vsel %vm1936_vm3, %v3431_v20, 0.0 }
 0x2cf   : > { %v3436_v47 = vpop.eup %2781  ;;  %v1984_v28 = vpop.xlane.xlu0 %1983  ;;  %2181 = vadd.xlane.f32.xlu0 %v2180_v26 }
 0x2d0   : > { %2795 = vpow2.f32 %v2115_v4  ;;  %v2113_v2 = vmul.f32 1.442695, %v2057_v45  ;;  %v2048_v30 = vsub.f32 %v3324_v9, %v1984_v28  ;;  %v2177_v34 = vsel %vm1936_vm3, %v3436_v47, 0.0 }
 0x2d1   : > { %v3441_v36 = vpop.eup %2783  ;;  %v1981_v38 = vpop.xlane.xlu1 %1980  ;;  %2178 = vadd.xlane.f32.xlu1 %v2177_v34 }
 0x2d2   : > { %2797 = vpow2.f32 %v2113_v2  ;;  %v2095_v6 = vmul.f32 1.442695, %v2048_v30  ;;  %v2047_v49 = vsub.f32 %v3330_v12, %v1981_v38  ;;  %v2162_v40 = vsel %vm1936_vm3, %v3441_v36, 0.0 }
 0x2d3   : > { %v3446_v42 = vpop.eup %2785  ;;  %2163 = vadd.xlane.f32.xlu0 %v2162_v40  ;;  %v2026_v52 = vpop.xlane.xlu0 %2025 }
 0x2d4   : > { %2799 = vpow2.f32 %v2095_v6  ;;  %v2093_v9 = vmul.f32 1.442695, %v2047_v49  ;;  %v2062_v44 = vsub.f32 %v3326_v10, %v2026_v52  ;;  %v2159_v46 = vsel %vm1936_vm3, %v3446_v42, 0.0 }
 0x2d5   : > { %v3451_v48 = vpop.eup %2787  ;;  %2160 = vadd.xlane.f32.xlu1 %v2159_v46  ;;  %v2023_v53 = vpop.xlane.xlu1 %2022 }
 0x2d6   : > { %2801 = vpow2.f32 %v2093_v9  ;;  %v2123_v12 = vmul.f32 1.442695, %v2062_v44  ;;  %v2061_v55 = vsub.f32 %v3334_v14, %v2023_v53  ;;  %v2192_v50 = vsel %vm1936_vm3, %v3451_v48, 0.0 }
 0x2d7   : > { %v3456_v56 = vpop.eup %2789  ;;  %2193 = vadd.xlane.f32.xlu0 %v2192_v50  ;;  %v1996_v33 = vpop.xlane.xlu0 %1995 }
 0x2d8   : > { %2803 = vpow2.f32 %v2123_v12  ;;  %v2121_v10 = vmul.f32 1.442695, %v2061_v55  ;;  %v2052_v54 = vsub.f32 %v3340_v17, %v1996_v33  ;;  %v2189_v63 = vsel %vm1936_vm3, %v3456_v56, 0.0 }
 0x2d9   : > { %v3461_v57 = vpop.eup %2791  ;;  %2190 = vadd.xlane.f32.xlu1 %v2189_v63  ;;  %v1993_v35 = vpop.xlane.xlu1 %1992 }
 0x2da   : > { %2805 = vpow2.f32 %v2121_v10  ;;  %v2103_v14 = vmul.f32 1.442695, %v2052_v54  ;;  %v2051_v0 = vsub.f32 %v3344_v19, %v1993_v35  ;;  %v2168_v60 = vsel %vm1936_vm3, %v3461_v57, 0.0 }
 0x2db   : > { %v3466_v3 = vpop.eup %2793  ;;  %2169 = vadd.xlane.f32.xlu0 %v2168_v60 }
 0x2dc   : > { %2807 = vpow2.f32 %v2103_v14  ;;  %v2101_v5 = vmul.f32 1.442695, %v2051_v0  ;;  %v2165_v17 = vsel %vm1936_vm3, %v3466_v3, 0.0 }
 0x2dd   : > { %v3470_v39 = vpop.eup %2795  ;;  %2166 = vadd.xlane.f32.xlu1 %v2165_v17 }
 0x2de   : > { %2809 = vpow2.f32 %v2101_v5  ;;  %v2204_v7 = vsel %vm1936_vm3, %v3470_v39, 0.0 }
 0x2df   : > { %v3474_v11 = vpop.eup %2797  ;;  %2205 = vadd.xlane.f32.xlu0 %v2204_v7  ;;  %v2008_v19 = vpop.xlane.xlu0 %2007 }
 0x2e0   : > { %v2056_v58 = vsub.f32 %v3348_v21, %v2008_v19  ;;  %v2201_v43 = vsel %vm1936_vm3, %v3474_v11, 0.0 }
 0x2e1   : > { %v3479_v15 = vpop.eup %2799  ;;  %2202 = vadd.xlane.f32.xlu1 %v2201_v43  ;;  %v2005_v62 = vpop.xlane.xlu1 %2004 }
 0x2e2   : > { %v2111_v16 = vmul.f32 1.442695, %v2056_v58  ;;  %v2055_v1 = vsub.f32 %v3352_v23, %v2005_v62  ;;  %v2174_v22 = vsel %vm1936_vm3, %v3479_v15, 0.0 }
 0x2e3   : > { %v3484_v4 = vpop.eup %2801  ;;  %2175 = vadd.xlane.f32.xlu0 %v2174_v22 }
 0x2e4   : > { %2811 = vpow2.f32 %v2111_v16  ;;  %v2109_v45 = vmul.f32 1.442695, %v2055_v1  ;;  %v2171_v21 = vsel %vm1936_vm3, %v3484_v4, 0.0 }
 0x2e5   : > { %v3488_v26 = vpop.eup %2803  ;;  %2172 = vadd.xlane.f32.xlu1 %v2171_v21 }
 0x2e6   : > { %2813 = vpow2.f32 %v2109_v45  ;;  %v2216_v28 = vsel %vm1936_vm3, %v3488_v26, 0.0 }
 0x2e7   : > { %v3492_v2 = vpop.eup %2805  ;;  %2217 = vadd.xlane.f32.xlu0 %v2216_v28  ;;  %v2020_v23 = vpop.xlane.xlu0 %2019 }
 0x2e8   : > { %v2060_v30 = vsub.f32 %v3356_v25, %v2020_v23  ;;  %v2213_v34 = vsel %vm1936_vm3, %v3492_v2, 0.0 }
 0x2e9   : > { %v3497_v38 = vpop.eup %2807  ;;  %2214 = vadd.xlane.f32.xlu1 %v2213_v34  ;;  %v2017_v6 = vpop.xlane.xlu1 %2016 }
 0x2ea   : > { %v2119_v49 = vmul.f32 1.442695, %v2060_v30  ;;  %v2059_v40 = vsub.f32 %v3360_v27, %v2017_v6  ;;  %v2186_v52 = vsel %vm1936_vm3, %v3497_v38, 0.0 }
 0x2eb   : > { %v3502_v9 = vpop.eup %2809  ;;  %2187 = vadd.xlane.f32.xlu0 %v2186_v52 }
 0x2ec   : > { %2815 = vpow2.f32 %v2119_v49  ;;  %v2117_v44 = vmul.f32 1.442695, %v2059_v40  ;;  %v2183_v25 = vsel %vm1936_vm3, %v3502_v9, 0.0 }
 0x2ed   : > { %2184 = vadd.xlane.f32.xlu1 %v2183_v25 }
 0x2ee   : > { %2817 = vpow2.f32 %v2117_v44 }
 0x2ef   : > { %v2032_v46 = vpop.xlane.xlu0 %2031 }
 0x2f0   : > { %v2064_v53 = vsub.f32 %v3364_v29, %v2032_v46 }
 0x2f1   : > { %v3507_v12 = vpop.eup %2811  ;;  %v2029_v55 = vpop.xlane.xlu1 %2028 }
 0x2f2   : > { %v2127_v27 = vmul.f32 1.442695, %v2064_v53  ;;  %v2063_v50 = vsub.f32 %v3368_v31, %v2029_v55  ;;  %v2198_v33 = vsel %vm1936_vm3, %v3507_v12, 0.0 }
 0x2f3   : > { %v3512_v10 = vpop.eup %2813  ;;  %2199 = vadd.xlane.f32.xlu0 %v2198_v33 }
 0x2f4   : > { %2819 = vpow2.f32 %v2127_v27  ;;  %v2125_v54 = vmul.f32 1.442695, %v2063_v50  ;;  %v2195_v63 = vsel %vm1936_vm3, %v3512_v10, 0.0 }
 0x2f5   : > { %2196 = vadd.xlane.f32.xlu1 %v2195_v63 }
 0x2f6   : > { %2821 = vpow2.f32 %v2125_v54 }
 0x2f9   : > { %v3516_v29 = vpop.eup %2815 }
 0x2fa   : > { %v2210_v35 = vsel %vm1936_vm3, %v3516_v29, 0.0 }
 0x2fb   : > { %v3520_v14 = vpop.eup %2817  ;;  %2211 = vadd.xlane.f32.xlu0 %v2210_v35 }
 0x2fc   : > { %v2207_v31 = vsel %vm1936_vm3, %v3520_v14, 0.0 }
 0x2fd   : > { %2208 = vadd.xlane.f32.xlu1 %v2207_v31 }
 0x301   : > { %v3524_v0 = vpop.eup %2819 }
 0x302   : > { %v2222_v60 = vsel %vm1936_vm3, %v3524_v0, 0.0 }
 0x303   : > { %v3528_v5 = vpop.eup %2821  ;;  %2223 = vadd.xlane.f32.xlu0 %v2222_v60 }
 0x304   : > { %v2219_v17 = vsel %vm1936_vm3, %v3528_v5, 0.0 }
 0x305   : > { %2220 = vadd.xlane.f32.xlu1 %v2219_v17 }
 0x334   : > { %v2134_v7 = vpop.xlane.xlu0 %2133 }
 0x335   : > { %2823 = vrcp.f32 %v2134_v7 }
 0x336   : > { %v2131_v19 = vpop.xlane.xlu1 %2130 }
 0x337   : > { %2825 = vrcp.f32 %v2131_v19 }
 0x33c   : > { %v2140_v58 = vpop.xlane.xlu0 %2139 }
 0x33d   : > { %2827 = vrcp.f32 %v2140_v58 }
 0x340   : > { %v2137_v43 = vpop.xlane.xlu1 %2136 }
 0x341   : > { %2829 = vrcp.f32 %v2137_v43 }
 0x342   : > { %v2824_v62 = vpop.eup %2823 }
 0x343   : > { %v2258_v16 = vmul.f32 %v2824_v62, %v3377_v61 }
 0x344   : > { %v2826_v1 = vpop.eup %2825  ;;  %v2146_v22 = vpop.xlane.xlu0 %2145 }
 0x345   : > { %2290 = vst.msk [vmem:[%s3537_s21 + $0x8] sm:$0xff] %vm1936_vm3, %v2258_v16  ;;  %v2257_v45 = vmul.f32 %v2826_v1, %v3382_v37  ;;  %2831 = vrcp.f32 %v2146_v22 }
 0x346   : > { %v2143_v21 = vpop.xlane.xlu1 %2142 }
 0x347   : > { %2289 = vst.msk [vmem:[%s3537_s21] sm:$0xff] %vm1936_vm3, %v2257_v45  ;;  %2833 = vrcp.f32 %v2143_v21 }
 0x34a   : > { %v2828_v28 = vpop.eup %2827 }
 0x34b   : > { %v2260_v23 = vmul.f32 %v2828_v28, %v3387_v8 }
 0x34c   : > { %v2152_v30 = vpop.xlane.xlu0 %2151 }
 0x34d   : > { %2292 = vst.msk [vmem:[%s3537_s21 + $0x18] sm:$0xff] %vm1936_vm3, %v2260_v23  ;;  %2835 = vrcp.f32 %v2152_v30 }
 0x34e   : > { %v2830_v61 = vpop.eup %2829  ;;  %v2149_v34 = vpop.xlane.xlu1 %2148 }
 0x34f   : > { %v2259_v6 = vmul.f32 %v2830_v61, %v3392_v18  ;;  %2837 = vrcp.f32 %v2149_v34 }
 0x351   : > { %2291 = vst.msk [vmem:[%s3537_s21 + $0x10] sm:$0xff] %vm1936_vm3, %v2259_v6 }
 0x352   : > { %v2832_v37 = vpop.eup %2831 }
 0x353   : > { %v2262_v49 = vmul.f32 %v2832_v37, %v3397_v24 }
 0x354   : > { %v2834_v40 = vpop.eup %2833  ;;  %v2158_v52 = vpop.xlane.xlu0 %2157 }
 0x355   : > { %2294 = vst.msk [vmem:[%s3537_s21 + $0x28] sm:$0xff] %vm1936_vm3, %v2262_v49  ;;  %v2261_v8 = vmul.f32 %v2834_v40, %v3402_v32  ;;  %2839 = vrcp.f32 %v2158_v52 }
 0x356   : > { %v2155_v44 = vpop.xlane.xlu1 %2154 }
 0x357   : > { %2293 = vst.msk [vmem:[%s3537_s21 + $0x20] sm:$0xff] %vm1936_vm3, %v2261_v8  ;;  %2841 = vrcp.f32 %v2155_v44 }
 0x358   : > { %v2182_v18 = vpop.xlane.xlu0 %2181 }
 0x359   : > { %2843 = vrcp.f32 %v2182_v18 }
 0x35a   : > { %v2836_v25 = vpop.eup %2835  ;;  %v2179_v46 = vpop.xlane.xlu1 %2178 }
 0x35b   : > { %v2264_v53 = vmul.f32 %v2836_v25, %v3409_v51  ;;  %2845 = vrcp.f32 %v2179_v46 }
 0x35c   : > { %v2838_v24 = vpop.eup %2837  ;;  %v2164_v55 = vpop.xlane.xlu0 %2163 }
 0x35d   : > { %2296 = vst.msk [vmem:[%s3537_s21 + $0x38] sm:$0xff] %vm1936_vm3, %v2264_v53  ;;  %v2263_v32 = vmul.f32 %v2838_v24, %v3414_v59  ;;  %2847 = vrcp.f32 %v2164_v55 }
 0x35e   : > { %v2161_v27 = vpop.xlane.xlu1 %2160 }
 0x35f   : > { %2295 = vst.msk [vmem:[%s3537_s21 + $0x30] sm:$0xff] %vm1936_vm3, %v2263_v32  ;;  %2849 = vrcp.f32 %v2161_v27 }
 0x360   : > { %v2194_v50 = vpop.xlane.xlu0 %2193 }
 0x361   : > { %2851 = vrcp.f32 %v2194_v50 }
 0x362   : > { %v2840_v33 = vpop.eup %2839  ;;  %v2191_v54 = vpop.xlane.xlu1 %2190 }
 0x363   : > { %v2266_v51 = vmul.f32 %v2840_v33, %v3421_v41  ;;  %2853 = vrcp.f32 %v2191_v54 }
 0x364   : > { %v2842_v63 = vpop.eup %2841  ;;  %v2170_v35 = vpop.xlane.xlu0 %2169 }
 0x365   : > { %2298 = vst.msk [vmem:[%s3537_s21 + $0x48] sm:$0xff] %vm1936_vm3, %v2266_v51  ;;  %v2265_v59 = vmul.f32 %v2842_v63, %v3426_v13  ;;  %2855 = vrcp.f32 %v2170_v35 }
 0x366   : > { %v2844_v31 = vpop.eup %2843  ;;  %v2167_v60 = vpop.xlane.xlu1 %2166 }
 0x367   : > { %2297 = vst.msk [vmem:[%s3537_s21 + $0x40] sm:$0xff] %vm1936_vm3, %v2265_v59  ;;  %v2274_v17 = vmul.f32 %v2844_v31, %v3431_v20  ;;  %2857 = vrcp.f32 %v2167_v60 }
 0x368   : > { %v2846_v7 = vpop.eup %2845  ;;  %v2206_v19 = vpop.xlane.xlu0 %2205 }
 0x369   : > { %2306 = vst.msk [vmem:[%s3537_s21 + $0x88] sm:$0xff] %vm1936_vm3, %v2274_v17  ;;  %v2273_v41 = vmul.f32 %v2846_v7, %v3436_v47  ;;  %2859 = vrcp.f32 %v2206_v19 }
 0x36a   : > { %v2848_v58 = vpop.eup %2847  ;;  %v2203_v43 = vpop.xlane.xlu1 %2202 }
 0x36b   : > { %2305 = vst.msk [vmem:[%s3537_s21 + $0x80] sm:$0xff] %vm1936_vm3, %v2273_v41  ;;  %v2268_v13 = vmul.f32 %v2848_v58, %v3441_v36  ;;  %2861 = vrcp.f32 %v2203_v43 }
 0x36c   : > { %v2850_v62 = vpop.eup %2849  ;;  %v2176_v16 = vpop.xlane.xlu0 %2175 }
 0x36d   : > { %2300 = vst.msk [vmem:[%s3537_s21 + $0x58] sm:$0xff] %vm1936_vm3, %v2268_v13  ;;  %v2267_v20 = vmul.f32 %v2850_v62, %v3446_v42  ;;  %2863 = vrcp.f32 %v2176_v16 }
 0x36e   : > { %v2852_v1 = vpop.eup %2851  ;;  %v2173_v22 = vpop.xlane.xlu1 %2172 }
 0x36f   : > { %2299 = vst.msk [vmem:[%s3537_s21 + $0x50] sm:$0xff] %vm1936_vm3, %v2267_v20  ;;  %v2278_v47 = vmul.f32 %v2852_v1, %v3451_v48  ;;  %2865 = vrcp.f32 %v2173_v22 }
 0x370   : > { %v2854_v45 = vpop.eup %2853  ;;  %v2218_v21 = vpop.xlane.xlu0 %2217 }
 0x371   : > { %2310 = vst.msk [vmem:[%s3537_s21 + $0xa8] sm:$0xff] %vm1936_vm3, %v2278_v47  ;;  %v2277_v36 = vmul.f32 %v2854_v45, %v3456_v56  ;;  %2867 = vrcp.f32 %v2218_v21 }
 0x372   : > { %v2856_v28 = vpop.eup %2855  ;;  %v2215_v42 = vpop.xlane.xlu1 %2214 }
 0x373   : > { %2309 = vst.msk [vmem:[%s3537_s21 + $0xa0] sm:$0xff] %vm1936_vm3, %v2277_v36  ;;  %v2270_v23 = vmul.f32 %v2856_v28, %v3461_v57  ;;  %2869 = vrcp.f32 %v2215_v42 }
 0x374   : > { %v2858_v30 = vpop.eup %2857  ;;  %v2188_v48 = vpop.xlane.xlu0 %2187 }
 0x375   : > { %2302 = vst.msk [vmem:[%s3537_s21 + $0x68] sm:$0xff] %vm1936_vm3, %v2270_v23  ;;  %v2269_v61 = vmul.f32 %v2858_v30, %v3466_v3  ;;  %2871 = vrcp.f32 %v2188_v48 }
 0x376   : > { %v2860_v34 = vpop.eup %2859  ;;  %v2185_v56 = vpop.xlane.xlu1 %2184 }
 0x377   : > { %2301 = vst.msk [vmem:[%s3537_s21 + $0x60] sm:$0xff] %vm1936_vm3, %v2269_v61  ;;  %v2282_v6 = vmul.f32 %v2860_v34, %v3470_v39  ;;  %2873 = vrcp.f32 %v2185_v56 }
 0x378   : > { %v2862_v37 = vpop.eup %2861 }
 0x379   : > { %2314 = vst.msk [vmem:[%s3537_s21 + $0xc8] sm:$0xff] %vm1936_vm3, %v2282_v6  ;;  %v2281_v57 = vmul.f32 %v2862_v37, %v3474_v11 }
 0x37a   : > { %v2864_v49 = vpop.eup %2863 }
 0x37b   : > { %2313 = vst.msk [vmem:[%s3537_s21 + $0xc0] sm:$0xff] %vm1936_vm3, %v2281_v57  ;;  %v2272_v3 = vmul.f32 %v2864_v49, %v3479_v15 }
 0x37c   : > { %v2866_v40 = vpop.eup %2865  ;;  %v2200_v52 = vpop.xlane.xlu0 %2199 }
 0x37d   : > { %2304 = vst.msk [vmem:[%s3537_s21 + $0x78] sm:$0xff] %vm1936_vm3, %v2272_v3  ;;  %v2271_v39 = vmul.f32 %v2866_v40, %v3484_v4  ;;  %2875 = vrcp.f32 %v2200_v52 }
 0x37e   : > { %v2868_v8 = vpop.eup %2867  ;;  %v2197_v44 = vpop.xlane.xlu1 %2196 }
 0x37f   : > { %2303 = vst.msk [vmem:[%s3537_s21 + $0x70] sm:$0xff] %vm1936_vm3, %v2271_v39  ;;  %v2286_v11 = vmul.f32 %v2868_v8, %v3488_v26  ;;  %2877 = vrcp.f32 %v2197_v44 }
 0x380   : > { %v2870_v18 = vpop.eup %2869 }
 0x381   : > { %2318 = vst.msk [vmem:[%s3537_s21 + $0xe8] sm:$0xff] %vm1936_vm3, %v2286_v11  ;;  %v2285_v15 = vmul.f32 %v2870_v18, %v3492_v2 }
 0x382   : > { %v2872_v25 = vpop.eup %2871 }
 0x383   : > { %2317 = vst.msk [vmem:[%s3537_s21 + $0xe0] sm:$0xff] %vm1936_vm3, %v2285_v15  ;;  %v2276_v4 = vmul.f32 %v2872_v25, %v3497_v38 }
 0x384   : > { %v2874_v46 = vpop.eup %2873  ;;  %v2212_v53 = vpop.xlane.xlu0 %2211 }
 0x385   : > { %2308 = vst.msk [vmem:[%s3537_s21 + $0x98] sm:$0xff] %vm1936_vm3, %v2276_v4  ;;  %v2275_v24 = vmul.f32 %v2874_v46, %v3502_v9  ;;  %2879 = vrcp.f32 %v2212_v53 }
 0x386   : > { %v2209_v26 = vpop.xlane.xlu1 %2208 }
 0x387   : > { %2307 = vst.msk [vmem:[%s3537_s21 + $0x90] sm:$0xff] %vm1936_vm3, %v2275_v24  ;;  %2881 = vrcp.f32 %v2209_v26 }
 0x38a   : > { %v2876_v2 = vpop.eup %2875 }
 0x38b   : > { %v2280_v55 = vmul.f32 %v2876_v2, %v3507_v12 }
 0x38c   : > { %v2878_v32 = vpop.eup %2877  ;;  %v2224_v27 = vpop.xlane.xlu0 %2223 }
 0x38d   : > { %2312 = vst.msk [vmem:[%s3537_s21 + $0xb8] sm:$0xff] %vm1936_vm3, %v2280_v55  ;;  %v2279_v38 = vmul.f32 %v2878_v32, %v3512_v10  ;;  %2883 = vrcp.f32 %v2224_v27 }
 0x38e   : > { %v2221_v9 = vpop.xlane.xlu1 %2220 }
 0x38f   : > { %2311 = vst.msk [vmem:[%s3537_s21 + $0xb0] sm:$0xff] %vm1936_vm3, %v2279_v38  ;;  %2885 = vrcp.f32 %v2221_v9 }
 0x392   : > { %v2880_v50 = vpop.eup %2879 }
 0x393   : > { %v2284_v33 = vmul.f32 %v2880_v50, %v3516_v29 }
 0x394   : > { %v2882_v54 = vpop.eup %2881 }
 0x395   : > { %2316 = vst.msk [vmem:[%s3537_s21 + $0xd8] sm:$0xff] %vm1936_vm3, %v2284_v33  ;;  %v2283_v12 = vmul.f32 %v2882_v54, %v3520_v14 }
 0x397   : > { %2315 = vst.msk [vmem:[%s3537_s21 + $0xd0] sm:$0xff] %vm1936_vm3, %v2283_v12 }
 0x39a   : > { %v2884_v51 = vpop.eup %2883 }
 0x39b   : > { %v2288_v63 = vmul.f32 %v2884_v51, %v3524_v0 }
 0x39c   : > { %v2886_v10 = vpop.eup %2885 }
 0x39d   : > { %2320 = vst.msk [vmem:[%s3537_s21 + $0xf8] sm:$0xff] %vm1936_vm3, %v2288_v63  ;;  %v2287_v35 = vmul.f32 %v2886_v10, %v3528_v5 }
 0x39f   : > { %2319 = vst.msk [vmem:[%s3537_s21 + $0xf0] sm:$0xff] %vm1936_vm3, %v2287_v35 }
 0x3a0 PF: > { %s12_s9 = sadd.s32 1, %s2893_s9  }
 0x3a1   : > { %p9_p4 = scmp.ge.s32.totalorder %s12_s9, 4  }
 0x3a3   :  { %11 = sbr.rel (!%p9_p4) target bundleno = 1 (0x1), region = 58 }

</bundles_post_ra>
